<compile_context>
chip_gen: v5e
topology: v5e:2x2
jax: 0.10.0
libtpu: 0.0.40
codegen_flags: <defaults>
</compile_context>

<pallas_src>
import numpy as np
import jax
import jax.numpy as jnp
from jax.experimental import pallas as pl
from jax.experimental.pallas import tpu as pltpu

BN_EPS = 1e-5
F_RAW = 400        # linear1 output features
F_PAD = 512        # padded to a multiple of 128 lanes
OUT_LANES = 128    # lane-dense output block; caller keeps column 0


def critic_kernel(state_ref, action_ref,
                  w1_ref,                # linear1 weights: (20, 512), zero-padded
                  gamma_ref, beta_ref,   # BatchNorm affine (1, 512), padded 0
                  wsT_ref,               # folded post-ReLU weights  (1, 512)
                  waT_ref,               # folded action weights     (1, 4)
                  bq_ref,                # folded scalar bias, SMEM  (1, 1)
                  out_ref):              # (B, 128) lane-dense output
    # ----- h = state @ W1  — the only MXU matmul left -----
    # b1 is intentionally omitted: it cancels exactly under train-mode BN.
    h = jnp.dot(state_ref[...], w1_ref[...],
                preferred_element_type=jnp.float32)

    # ----- BatchNorm1d (training-mode batch stats), centered variance -----
    mean = jnp.mean(h, axis=0, keepdims=True)
    c = h - mean
    var = jnp.mean(c * c, axis=0, keepdims=True)          # >= 0 by construction
    scale = gamma_ref[...] * jax.lax.rsqrt(var + BN_EPS)   # EUP rsqrt
    r = c * scale + beta_ref[...]

    # ----- ReLU -----
    r = jnp.maximum(r, 0.0)

    # ----- folded linear3 -> linear4 -> output chain -----
    # q = r @ Ws + action @ Wa + bq, done as VPU multiply + XLU lane-reduce
    # instead of pushing N=1 tiles through the MXU.
    qs = jnp.sum(r * wsT_ref[...], axis=-1, keepdims=True)                 # (B,1)
    qa = jnp.sum(action_ref[...] * waT_ref[...], axis=-1, keepdims=True)   # (B,1)
    q = qs + qa + bq_ref[0, 0]                                             # SMEM scalar

    # lane-dense store; wrapper slices column 0
    out_ref[...] = jnp.broadcast_to(q, out_ref.shape)


def init_params(key):
    """PyTorch-style init: U(-1/sqrt(fan_in), 1/sqrt(fan_in)), weights stored
    as (in_features, out_features)."""
    def linear(key, fan_in, fan_out):
        kw, kb = jax.random.split(key)
        bound = 1.0 / jnp.sqrt(jnp.float32(fan_in))
        w = jax.random.uniform(kw, (fan_in, fan_out), jnp.float32, -bound, bound)
        b = jax.random.uniform(kb, (1, fan_out), jnp.float32, -bound, bound)
        return w, b

    k1, k2, k3, k4, ko = jax.random.split(key, 5)
    w1, b1 = linear(k1, 20, 400)
    w2, b2 = linear(k2, 4, 300)
    w3, b3 = linear(k3, 400, 300)
    w4, b4 = linear(k4, 600, 300)
    wo, bo = linear(ko, 300, 1)
    gamma = jnp.ones((1, 400), jnp.float32)   # BatchNorm1d default affine init
    beta = jnp.zeros((1, 400), jnp.float32)
    return dict(w1=w1, b1=b1, gamma=gamma, beta=beta,
                w2=w2, b2=b2, w3=w3, b3=b3, w4=w4, b4=b4, wo=wo, bo=bo)


def fold_params(p):
    """Offline algebraic folding (in float64) + 128-lane padding, done once.

    b1 is NOT shipped to the kernel: it cancels under training-mode BN."""
    f64 = lambda k: np.asarray(p[k], np.float64)
    w2, b2 = f64("w2"), f64("b2")
    w3, b3 = f64("w3"), f64("b3")
    w4, b4 = f64("w4"), f64("b4")
    wo, bo = f64("wo"), f64("bo")

    w4s = w4[:300, :]            # rows multiplying the s half of the concat
    w4a = w4[300:, :]            # rows multiplying the a half

    ws = w3 @ w4s @ wo                                        # (400, 1)
    wa = w2 @ w4a @ wo                                        # (4, 1)
    bq = (b3 @ w4s + b2 @ w4a + b4) @ wo + bo                 # (1, 1)

    pad = ((0, 0), (0, F_PAD - F_RAW))
    return dict(
        w1=jnp.pad(p["w1"], pad),
        gamma=jnp.pad(p["gamma"], pad),
        beta=jnp.pad(p["beta"], pad),
        wsT=jnp.pad(jnp.asarray(ws.T, jnp.float32), pad),     # (1, 512)
        waT=jnp.asarray(wa.T, jnp.float32),                   # (1, 4)
        bq=jnp.asarray(bq, jnp.float32),                      # (1, 1) -> SMEM
    )


def critic_forward(state, action, folded):
    B = state.shape[0]
    vmem = pl.BlockSpec(memory_space=pltpu.VMEM)
    smem = pl.BlockSpec(memory_space=pltpu.SMEM)
    args = (
        state, action,
        folded["w1"],
        folded["gamma"], folded["beta"],
        folded["wsT"], folded["waT"], folded["bq"],
    )
    out = pl.pallas_call(
        critic_kernel,
        out_shape=jax.ShapeDtypeStruct((B, OUT_LANES), jnp.float32),
        in_specs=[vmem] * (len(args) - 1) + [smem],   # bq lives in SMEM
        out_specs=vmem,
    )(*args)
    return out[:, :1]


def critic_forward_ref(state, action, params):
    """Pure-JAX reference of the original (unfolded) forward.

    Run at full f32 matmul precision so the comparison is not polluted by
    XLA's default bf16-pass matmul emulation."""
    with jax.default_matmul_precision("float32"):
        s = state @ params["w1"] + params["b1"]
        mean = jnp.mean(s, axis=0, keepdims=True)
        var = jnp.mean((s - mean) ** 2, axis=0, keepdims=True)
        s = (s - mean) / jnp.sqrt(var + BN_EPS) * params["gamma"] + params["beta"]
        s = jnp.maximum(s, 0.0)
        s = s @ params["w3"] + params["b3"]
        a = action @ params["w2"] + params["b2"]
        o = jnp.concatenate([s, a], axis=1) @ params["w4"] + params["b4"]
        return o @ params["wo"] + params["bo"]


if __name__ == "__main__":
    key = jax.random.PRNGKey(0)
    kp, ks, ka = jax.random.split(key, 3)

    params = init_params(kp)
    folded = fold_params(params)

    B = 8
    state = jax.random.normal(ks, (B, 20), jnp.float32)
    action = jax.random.normal(ka, (B, 4), jnp.float32)

    out = critic_forward(state, action, folded)
    out = jax.block_until_ready(out)

    ref = critic_forward_ref(state, action, params)
    assert out.shape == (B, 1), out.shape
    # With f64 offline folding, centered variance and full-precision f32
    # matmuls on both sides the observed agreement is ~1e-6; keep a
    # conservative 1e-3 bound so the check is robust to matmul-precision
    # defaults across compiler versions while still catching real bugs.
    assert jnp.allclose(out, ref, atol=1e-3, rtol=1e-3), (out, ref)

    print("KERNEL_OK")
</pallas_src>

<mosaic_0001>
module attributes {stable_mosaic.version = 11 : i64} {
  func.func @critic_kernel(%arg0: memref<8x20xf32, #tpu.memory_space<vmem>>, %arg1: memref<8x4xf32, #tpu.memory_space<vmem>>, %arg2: memref<20x512xf32, #tpu.memory_space<vmem>>, %arg3: memref<1x512xf32, #tpu.memory_space<vmem>>, %arg4: memref<1x512xf32, #tpu.memory_space<vmem>>, %arg5: memref<1x512xf32, #tpu.memory_space<vmem>>, %arg6: memref<1x4xf32, #tpu.memory_space<vmem>>, %arg7: memref<1x1xf32, #tpu.memory_space<smem>>, %arg8: memref<8x128xf32, #tpu.memory_space<vmem>>) attributes {dimension_semantics = [], scalar_prefetch = 0 : i64, scratch_operands = 0 : i64, tpu.core_type = #tpu.core_type<tc>} {
    %c0 = arith.constant 0 : index
    %c0_0 = arith.constant 0 : index
    %0 = vector.load %arg0[%c0, %c0_0] : memref<8x20xf32, #tpu.memory_space<vmem>>, vector<8x20xf32>
    %c0_1 = arith.constant 0 : index
    %c0_2 = arith.constant 0 : index
    %1 = vector.load %arg2[%c0_1, %c0_2] : memref<20x512xf32, #tpu.memory_space<vmem>>, vector<20x512xf32>
    %cst = arith.constant dense<0.000000e+00> : vector<8x512xf32>
    %2 = tpu.matmul %0, %1, %cst {dimension_numbers = #tpu.dot_dimension_numbers<[1], [0], [0], [1], [0, 0, 1, 1], [], []>} : vector<8x20xf32>, vector<20x512xf32>, vector<8x512xf32> -> vector<8x512xf32>
    %cst_3 = arith.constant dense<0.000000e+00> : vector<512xf32>
    %3 = vector.multi_reduction <add>, %2, %cst_3 [0] : vector<8x512xf32> to vector<512xf32>
    %4 = vector.shape_cast %3 : vector<512xf32> to vector<1x512xf32>
    %cst_4 = arith.constant 8.000000e+00 : f32
    %5 = vector.broadcast %cst_4 : f32 to vector<1x512xf32>
    %6 = arith.divf %4, %5 : vector<1x512xf32>
    %7 = vector.broadcast %6 : vector<1x512xf32> to vector<8x512xf32>
    %8 = arith.subf %2, %7 : vector<8x512xf32>
    %9 = arith.mulf %8, %8 : vector<8x512xf32>
    %cst_5 = arith.constant dense<0.000000e+00> : vector<512xf32>
    %10 = vector.multi_reduction <add>, %9, %cst_5 [0] : vector<8x512xf32> to vector<512xf32>
    %11 = vector.shape_cast %10 : vector<512xf32> to vector<1x512xf32>
    %cst_6 = arith.constant 8.000000e+00 : f32
    %12 = vector.broadcast %cst_6 : f32 to vector<1x512xf32>
    %13 = arith.divf %11, %12 : vector<1x512xf32>
    %c0_7 = arith.constant 0 : index
    %c0_8 = arith.constant 0 : index
    %14 = vector.load %arg3[%c0_7, %c0_8] : memref<1x512xf32, #tpu.memory_space<vmem>>, vector<1x512xf32>
    %cst_9 = arith.constant 9.99999974E-6 : f32
    %15 = vector.broadcast %cst_9 : f32 to vector<1x512xf32>
    %16 = arith.addf %13, %15 : vector<1x512xf32>
    %17 = math.rsqrt %16 : vector<1x512xf32>
    %18 = arith.mulf %14, %17 : vector<1x512xf32>
    %19 = vector.broadcast %18 : vector<1x512xf32> to vector<8x512xf32>
    %20 = arith.mulf %8, %19 : vector<8x512xf32>
    %c0_10 = arith.constant 0 : index
    %c0_11 = arith.constant 0 : index
    %21 = vector.load %arg4[%c0_10, %c0_11] : memref<1x512xf32, #tpu.memory_space<vmem>>, vector<1x512xf32>
    %22 = vector.broadcast %21 : vector<1x512xf32> to vector<8x512xf32>
    %23 = arith.addf %20, %22 : vector<8x512xf32>
    %cst_12 = arith.constant 0.000000e+00 : f32
    %24 = vector.broadcast %cst_12 : f32 to vector<8x512xf32>
    %25 = arith.maximumf %23, %24 : vector<8x512xf32>
    %c0_13 = arith.constant 0 : index
    %c0_14 = arith.constant 0 : index
    %26 = vector.load %arg5[%c0_13, %c0_14] : memref<1x512xf32, #tpu.memory_space<vmem>>, vector<1x512xf32>
    %27 = vector.broadcast %26 : vector<1x512xf32> to vector<8x512xf32>
    %28 = arith.mulf %25, %27 : vector<8x512xf32>
    %cst_15 = arith.constant dense<0.000000e+00> : vector<8xf32>
    %29 = vector.multi_reduction <add>, %28, %cst_15 [1] : vector<8x512xf32> to vector<8xf32>
    %30 = vector.shape_cast %29 : vector<8xf32> to vector<8x1xf32>
    %c0_16 = arith.constant 0 : index
    %c0_17 = arith.constant 0 : index
    %31 = vector.load %arg1[%c0_16, %c0_17] : memref<8x4xf32, #tpu.memory_space<vmem>>, vector<8x4xf32>
    %c0_18 = arith.constant 0 : index
    %c0_19 = arith.constant 0 : index
    %32 = vector.load %arg6[%c0_18, %c0_19] : memref<1x4xf32, #tpu.memory_space<vmem>>, vector<1x4xf32>
    %33 = vector.broadcast %32 : vector<1x4xf32> to vector<8x4xf32>
    %34 = arith.mulf %31, %33 : vector<8x4xf32>
    %cst_20 = arith.constant dense<0.000000e+00> : vector<8xf32>
    %35 = vector.multi_reduction <add>, %34, %cst_20 [1] : vector<8x4xf32> to vector<8xf32>
    %36 = vector.shape_cast %35 : vector<8xf32> to vector<8x1xf32>
    %37 = arith.addf %30, %36 : vector<8x1xf32>
    %c0_21 = arith.constant 0 : index
    %c0_22 = arith.constant 0 : index
    %38 = memref.load %arg7[%c0_21, %c0_22] : memref<1x1xf32, #tpu.memory_space<smem>>
    %39 = vector.broadcast %38 : f32 to vector<8x1xf32>
    %40 = arith.addf %37, %39 : vector<8x1xf32>
    %41 = vector.shape_cast %40 : vector<8x1xf32> to vector<8x1xf32>
    %42 = vector.broadcast %41 : vector<8x1xf32> to vector<8x128xf32>
    %c0_23 = arith.constant 0 : index
    %c0_24 = arith.constant 0 : index
    %43 = vector.load %arg8[%c0_23, %c0_24] : memref<8x128xf32, #tpu.memory_space<vmem>>, vector<8x128xf32>
    tpu.vector_store %arg8[%c0_23, %c0_24], %42 {strides = array<i32>} : memref<8x128xf32, #tpu.memory_space<vmem>>, vector<8x128xf32>,
    return
  }
}

</mosaic_0001>

<bundles_post_ra>
// kernel: tpu_custom_call.1
= control target key start
LH: loop header
LB: loop body
LE: loop exit
PB: predicated region body
PF: predicated region fallthrough
CT: control target
= control target key end

     0   :  { %14 = vsyncpa [#allocation4], 0  ;;  %s586_s0 = inlined_call_operand.vmem [shape: f32[8,20], index: 0, kind: input, shape index: {}]   ;;  %s587_s1 = inlined_call_operand.vmem [shape: f32[8,4], index: 1, kind: input, shape index: {}]   ;;  %s588_s2 = inlined_call_operand.hbm [shape: f32[20,512], index: 2, kind: input, shape index: {}]   ;;  %s589_s3 = inlined_call_operand.vmem [shape: f32[1,512], index: 3, kind: input, shape index: {}]   ;;  %s590_s4 = inlined_call_operand.vmem [shape: f32[1,512], index: 4, kind: input, shape index: {}]   ;;  %s591_s5 = inlined_call_operand.hbm [shape: f32[1,512], index: 5, kind: input, shape index: {}]   ;;  %s592_s6 = inlined_call_operand.vmem [shape: f32[1,4], index: 6, kind: input, shape index: {}]   ;;  %s593_s7 = inlined_call_operand.<no memory space> [shape: f32[1,1], index: 7, kind: input, shape index: {}]   ;;  %s594_s8 = inlined_call_operand.hbm [shape: f32[8,128], index: 8, kind: output, shape index: {}]  }
   0x1   :  { %15 = vsyncpa [#allocation7], 0 }
   0x2   :  { %16 = vsyncpa [#allocation5], 0  ;;  %s25_s29 = sshll.u32 %s588_s2, 4  ;;  %s488_s30 = smov [#allocation3]   ;;  %s26_s29 = int_to_ptr.hbm [resolvable:$true] %s25_s29 }
   0x3   :  { %s27_s9 = sshll.u32 %s488_s30, 4  ;;  %s43_s12 = sshll.u32 %s591_s5, 4  ;;  %s28_s9 = int_to_ptr.vmem [resolvable:$true] %s27_s9  ;;  %s44_s12 = int_to_ptr.hbm [resolvable:$true] %s43_s12 }
   0x4   :  { %s489_s13 = smov 512   ;;  %s490_s14 = smov 32  }
   0x5   :  { %33 = dma.hbm_to_vmem [thread:$0]  %s26_s29, 1536, %s28_s9, [#allocation4], %s489_s13, %s489_s13, %s490_s14  }
   0x6   :  { %s491_s15 = smov [#allocation6]  }
   0x7   :  { %s45_s16 = sshll.u32 %s491_s15, 4  ;;  %s46_s16 = int_to_ptr.vmem [resolvable:$true] %s45_s16 }
   0x8   :  { %48 = dma.hbm_to_vmem [thread:$0]  %s44_s12, 64, %s46_s16, [#allocation7]  }
   0x9   :  { %482 = dma.done.wait [#allocation4], 1536  }
   0xa   :  { %483 = vsyncadd [#allocation4], 4294965760 }
   0xb   :  { %484 = dma.done.wait [#allocation7], 64  }
   0xc   :  { %485 = vsyncadd [#allocation7], 4294967232  ;;  %vm78_vm0 = vcmask 1043456   ;;  %v70_v0 = vld [vmem:[#allocation3 + $0x40] sm:$0xf]  ;;  %v67_v5 = vld [vmem:[#allocation3 + $0x28] sm:$0xff] }
   0xd   :  { %v71_v1 = vld [vmem:[#allocation3 + $0x48] sm:$0xf]  ;;  %v72_v2 = vld [vmem:[#allocation3 + $0x50] sm:$0xf]  ;;  %385 = vmatpush.msk.msra.mxu0 %vm78_vm0, %v70_v0  ;;  %v73_v3 = vld [vmem:[#allocation3 + $0x58] sm:$0xf] }
   0xe   :  { %387 = vmatpush.msk.msra.mxu1 %vm78_vm0, %v71_v1  ;;  %v66_v4 = vld [vmem:[#allocation3 + $0x20] sm:$0xff]  ;;  %389 = vmatpush.msk.msra.mxu2 %vm78_vm0, %v72_v2  ;;  %v68_v6 = vld [vmem:[#allocation3 + $0x30] sm:$0xff]  ;;  %v69_v7 = vld [vmem:[#allocation3 + $0x38] sm:$0xff]  ;;  %vm74_vm1 = vcmask 162816   ;;  %v492_v13 = vmov 8.0   ;;  %vm294_vm13 = vcmask 1040384  }
   0xf   :  { %391 = vmatpush.msk.msra.mxu3 %vm78_vm0, %v73_v3  ;;  %v62_v8 = vld [vmem:[#allocation3] sm:$0xff]  ;;  %105 = vmatpush.msra.mxu0 %v66_v4  ;;  %v63_v9 = vld [vmem:[#allocation3 + $0x8] sm:$0xff]  ;;  %v64_v10 = vld [vmem:[#allocation3 + $0x10] sm:$0xff]  ;;  %400 = vrcp.f32 %v492_v13  ;;  %vm296_vm15 = vcmask 1042434   ;;  %s493_s24 = smov [#allocation8]   ;;  %s374_s27 = sshll.u32 %s594_s8, 4  ;;  %s375_s27 = int_to_ptr.hbm [resolvable:$true] %s374_s27 }
  0x10   :  { %125 = vmatpush.msra.mxu1 %v67_v5  ;;  %v65_v11 = vld [vmem:[#allocation3 + $0x18] sm:$0xff]  ;;  %145 = vmatpush.msra.mxu2 %v68_v6  ;;  %v61_v12 = vld [vmem:[%s586_s0] sm:$0xff]  ;;  %s372_s25 = sshll.u32 %s493_s24, 4  ;;  %s373_s25 = int_to_ptr.vmem [resolvable:$true] %s372_s25 }
  0x11   :  { %165 = vmatpush.msra.mxu3 %v69_v7  ;;  %106 = vmatpush.msra.mxu0 %v62_v8 }
  0x12   :  { %126 = vmatpush.msra.mxu1 %v63_v9  ;;  %146 = vmatpush.msra.mxu2 %v64_v10 }
  0x13   :  { %166 = vmatpush.msra.mxu3 %v65_v11  ;;  %386 = vmatmul.msk.f32.vlgmr.msra.gmra.mxu0 %vm74_vm1, %v61_v12 }
  0x14   :  { %388 = vmatmul.msk.f32.vlgmr.msra.gmra.mxu1 %vm74_vm1, %v61_v12  ;;  %390 = vmatmul.msk.f32.vlgmr.msra.gmra.mxu2 %vm74_vm1, %v61_v12 }
  0x15   :  { %392 = vmatmul.msk.f32.vlgmr.msra.gmra.mxu3 %vm74_vm1, %v61_v12  ;;  %v401_v14 = vpop.eup %400  ;;  %vm298_vm1 = vcmask 1041408  }
  0x16   :  { %v196_v15 = vmul.f32 8.0, %v401_v14  ;;  %vm200_vm2 = vweird.f32 %v401_v14 }
  0x18   :  { %v197_v16 = vsub.f32 1.0, %v196_v15 }
  0x1a   :  { %v198_v21 = vmul.f32 %v401_v14, %v197_v16 }
  0x1c   :  { %v199_v26 = vadd.f32 %v401_v14, %v198_v21 }
  0x1e   :  { %v201_v35 = vsel %vm200_vm2, %v401_v14, %v199_v26  ;;  %vm358_vm2 = vcmask 31744  }
  0x90   :  { %v108_v17 = vpop.f32.mrf.mxu0 }
  0x91   :  { %v128_v18 = vpop.f32.mrf.mxu1  ;;  %v171_v19 = vrot.slane %v108_v17, 4 }
  0x92   :  { %v177_v20 = vrot.slane %v128_v18, 4 }
  0x93   :  { %v172_v22 = vadd.f32 %v171_v19, %v108_v17 }
  0x94   :  { %v178_v23 = vadd.f32 %v177_v20, %v128_v18 }
  0x95   :  { %v173_v24 = vrot.slane %v172_v22, 2 }
  0x96   :  { %v179_v25 = vrot.slane %v178_v23, 2 }
  0x97   :  { %v174_v27 = vadd.f32 %v173_v24, %v172_v22  ;;  %v148_v29 = vpop.f32.mrf.mxu2 }
  0x98   :  { %v180_v28 = vadd.f32 %v179_v25, %v178_v23  ;;  %v168_v30 = vpop.f32.mrf.mxu3  ;;  %v183_v31 = vrot.slane %v148_v29, 4 }
  0x99   :  { %v189_v32 = vrot.slane %v168_v30, 4  ;;  %v175_v33 = vrot.slane %v174_v27, 1 }
  0x9a   :  { %v181_v34 = vrot.slane %v180_v28, 1  ;;  %v184_v36 = vadd.f32 %v183_v31, %v148_v29 }
  0x9b   :  { %v190_v37 = vadd.f32 %v189_v32, %v168_v30  ;;  %v176_v38 = vadd.f32 %v175_v33, %v174_v27 }
  0x9c   :  { %v182_v39 = vadd.f32 %v181_v34, %v180_v28  ;;  %v185_v40 = vrot.slane %v184_v36, 2 }
  0x9d   :  { %v191_v41 = vrot.slane %v190_v37, 2  ;;  %v202_v42 = vmul.f32 %v201_v35, %v176_v38 }
  0x9e   :  { %v203_v43 = vmul.f32 %v201_v35, %v182_v39  ;;  %v186_v44 = vadd.f32 %v185_v40, %v184_v36 }
  0x9f   :  { %v192_v45 = vadd.f32 %v191_v41, %v190_v37  ;;  %v548_v46 = vsub.f32 %v108_v17, %v202_v42 }
  0xa0   :  { %v550_v47 = vsub.f32 %v128_v18, %v203_v43  ;;  %v187_v48 = vrot.slane %v186_v44, 1 }
  0xa1   :  { %v193_v49 = vrot.slane %v192_v45, 1  ;;  %v210_v50 = vmul.f32 %v548_v46, %v548_v46 }
  0xa2   :  { %v211_v51 = vmul.f32 %v550_v47, %v550_v47  ;;  %v188_v52 = vadd.f32 %v187_v48, %v186_v44 }
  0xa3   :  { %v194_v53 = vadd.f32 %v193_v49, %v192_v45  ;;  %v214_v54 = vrot.slane %v210_v50, 4 }
  0xa4   :  { %v220_v55 = vrot.slane %v211_v51, 4  ;;  %v204_v56 = vmul.f32 %v201_v35, %v188_v52 }
  0xa5   :  { %v205_v57 = vmul.f32 %v201_v35, %v194_v53  ;;  %v215_v58 = vadd.f32 %v214_v54, %v210_v50 }
  0xa6   :  { %v221_v59 = vadd.f32 %v220_v55, %v211_v51  ;;  %v556_v60 = vsub.f32 %v148_v29, %v204_v56 }
  0xa7   :  { %v558_v61 = vsub.f32 %v168_v30, %v205_v57  ;;  %v216_v62 = vrot.slane %v215_v58, 2 }
  0xa8   :  { %v222_v63 = vrot.slane %v221_v59, 2  ;;  %v212_v0 = vmul.f32 %v556_v60, %v556_v60 }
  0xa9   :  { %v213_v1 = vmul.f32 %v558_v61, %v558_v61  ;;  %v217_v2 = vadd.f32 %v216_v62, %v215_v58  ;;  %v242_v62 = vld [vmem:[%s589_s3] sm:$0xf] }
  0xaa   :  { %v223_v3 = vadd.f32 %v222_v63, %v221_v59  ;;  %v226_v4 = vrot.slane %v212_v0, 4 }
  0xab   :  { %v232_v5 = vrot.slane %v213_v1, 4  ;;  %v218_v6 = vrot.slane %v217_v2, 1 }
  0xac   :  { %v224_v7 = vrot.slane %v223_v3, 1  ;;  %v227_v8 = vadd.f32 %v226_v4, %v212_v0 }
  0xad   :  { %v233_v9 = vadd.f32 %v232_v5, %v213_v1  ;;  %v219_v10 = vadd.f32 %v218_v6, %v217_v2  ;;  %v315_v2 = vld [vmem:[%s590_s4] sm:$0xf] }
  0xae   :  { %v225_v11 = vadd.f32 %v224_v7, %v223_v3  ;;  %v228_v12 = vrot.slane %v227_v8, 2  ;;  %v317_v5 = vperm.slane %v315_v2, 0  ;;  %v318_v6 = vperm.slane %v315_v2, 1 }
  0xaf   :  { %v234_v13 = vrot.slane %v233_v9, 2  ;;  %v238_v14 = vmul.f32 %v219_v10, %v201_v35  ;;  %v319_v7 = vperm.slane %v315_v2, 2 }
  0xb0   :  { %v239_v15 = vmul.f32 %v225_v11, %v201_v35  ;;  %v229_v16 = vadd.f32 %v228_v12, %v227_v8  ;;  %v320_v8 = vperm.slane %v315_v2, 3 }
  0xb1   :  { %v235_v17 = vadd.f32 %v234_v13, %v233_v9  ;;  %v243_v18 = vadd.f32 1e-05, %v238_v14  ;;  %v333_v13 = vld [vmem:[#allocation6] sm:$0xf] }
  0xb2   :  { %v244_v19 = vadd.f32 1e-05, %v239_v15  ;;  %v230_v20 = vrot.slane %v229_v16, 1 }
  0xb3   :  { %v236_v21 = vrot.slane %v235_v17, 1  ;;  %402 = vrsqrt.f32 %v243_v18  ;;  %vm253_vm14 = vweird.f32 %v243_v18 }
  0xb4   :  { %404 = vrsqrt.f32 %v244_v19  ;;  %v231_v22 = vadd.f32 %v230_v20, %v229_v16  ;;  %vm263_vm4 = vweird.f32 %v244_v19 }
  0xb5   :  { %v237_v23 = vadd.f32 %v236_v21, %v235_v17 }
  0xb6   :  { %v240_v24 = vmul.f32 %v231_v22, %v201_v35 }
  0xb7   :  { %v241_v25 = vmul.f32 %v237_v23, %v201_v35 }
  0xb8   :  { %v245_v26 = vadd.f32 1e-05, %v240_v24 }
  0xb9   :  { %v246_v27 = vadd.f32 1e-05, %v241_v25  ;;  %v403_v28 = vpop.eup %402 }
  0xba   :  { %v405_v29 = vpop.eup %404  ;;  %v248_v30 = vmul.f32 %v403_v28, %v243_v18  ;;  %406 = vrsqrt.f32 %v245_v26  ;;  %vm273_vm8 = vweird.f32 %v245_v26  ;;  %vm254_vm9 = vweird.f32 %v403_v28 }
  0xbb   :  { %v258_v31 = vmul.f32 %v405_v29, %v244_v19  ;;  %408 = vrsqrt.f32 %v246_v27  ;;  %vm264_vm3 = vweird.f32 %v405_v29  ;;  %vm283_vm11 = vweird.f32 %v246_v27  ;;  %vm255_vm0 = vmor %vm253_vm14, %vm254_vm9 }
  0xbc   :  { %v249_v33 = vmul.f32 %v403_v28, %v248_v30  ;;  %vm265_vm5 = vmor %vm263_vm4, %vm264_vm3  ;;  %v335_v18 = vperm.slane %v333_v13, 0  ;;  %v336_v19 = vperm.slane %v333_v13, 1 }
  0xbd   :  { %v259_v32 = vmul.f32 %v405_v29, %v258_v31 }
  0xbe   :  { %v250_v40 = vmul.f32 0.5, %v249_v33 }
  0xbf   :  { %v260_v34 = vmul.f32 0.5, %v259_v32 }
  0xc0   :  { %v407_v36 = vpop.eup %406  ;;  %v251_v45 = vsub.f32 1.5, %v250_v40 }
  0xc1   :  { %v409_v37 = vpop.eup %408  ;;  %v261_v38 = vsub.f32 1.5, %v260_v34  ;;  %v268_v39 = vmul.f32 %v407_v36, %v245_v26  ;;  %vm274_vm6 = vweird.f32 %v407_v36  ;;  %v352_v34 = vld [vmem:[%s587_s1] sm:$0xff] }
  0xc2   :  { %v278_v41 = vmul.f32 %v409_v37, %v246_v27  ;;  %vm284_vm7 = vweird.f32 %v409_v37  ;;  %v252_v53 = vmul.f32 %v403_v28, %v251_v45  ;;  %vm275_vm10 = vmor %vm273_vm8, %vm274_vm6  ;;  %v337_v27 = vperm.slane %v333_v13, 2 }
  0xc3   :  { %v269_v42 = vmul.f32 %v407_v36, %v268_v39  ;;  %v262_v43 = vmul.f32 %v405_v29, %v261_v38  ;;  %vm285_vm12 = vmor %vm283_vm11, %vm284_vm7  ;;  %v364_v39 = vstv %s593_s7 }
  0xc4   :  { %v279_v35 = vmul.f32 %v409_v37, %v278_v41  ;;  %v256_v63 = vsel %vm255_vm0, %v403_v28, %v252_v53 }
  0xc5   :  { %v270_v44 = vmul.f32 0.5, %v269_v42  ;;  %v266_v50 = vsel %vm265_vm5, %v405_v29, %v262_v43  ;;  %v338_v29 = vperm.slane %v333_v13, 3 }
  0xc6   :  { %v280_v48 = vmul.f32 0.5, %v279_v35  ;;  %v291_v55 = vrot.slane %v266_v50, 7 }
  0xc7   :  { %v271_v49 = vsub.f32 1.5, %v270_v44 }
  0xc8   :  { %v281_v51 = vsub.f32 1.5, %v280_v48  ;;  %v295_v0 = vsel %vm294_vm13, %v256_v63, %v291_v55 }
  0xc9   :  { %v272_v52 = vmul.f32 %v407_v36, %v271_v49 }
  0xca   :  { %v282_v54 = vmul.f32 %v409_v37, %v281_v51 }
  0xcb   :  { %v276_v56 = vsel %vm275_vm10, %v407_v36, %v272_v52 }
  0xcc   :  { %v292_v57 = vrot.slane %v276_v56, 6  ;;  %v286_v58 = vsel %vm285_vm12, %v409_v37, %v282_v54 }
  0xcd   :  { %v293_v59 = vrot.slane %v286_v58, 5 }
  0xcf   :  { %v297_v1 = vsel %vm296_vm15, %v292_v57, %v293_v59 }
  0xd0   :  { %v299_v3 = vsel %vm298_vm1, %v295_v0, %v297_v1 }
  0xd1   :  { %v301_v4 = vmul.f32 %v299_v3, %v242_v62 }
  0xd3   :  { %v306_v9 = vperm.slane %v301_v4, 3  ;;  %v303_v10 = vperm.slane %v301_v4, 0  ;;  %v304_v11 = vperm.slane %v301_v4, 1  ;;  %v305_v12 = vperm.slane %v301_v4, 2 }
  0xd5   :  { %v314_v14 = vmul.f32 %v306_v9, %v558_v61  ;;  %v311_v15 = vmul.f32 %v303_v10, %v548_v46  ;;  %v312_v16 = vmul.f32 %v304_v11, %v550_v47  ;;  %v313_v17 = vmul.f32 %v305_v12, %v556_v60  ;;  %v399_v60 = vld [vmem:[%s592_s6] ss:$0 sm:$0xff] }
  0xd6   :  { %v357_v36 = vmul.f32 %v399_v60, %v352_v34 }
  0xd7   :  { %v325_v20 = vadd.f32 %v317_v5, %v311_v15  ;;  %v326_v21 = vadd.f32 %v318_v6, %v312_v16  ;;  %v327_v22 = vadd.f32 %v319_v7, %v313_v17  ;;  %v328_v23 = vadd.f32 %v320_v8, %v314_v14 }
  0xd8   :  { %v359_v37 = vsel %vm358_vm2, %v357_v36, 0.0 }
  0xd9   :  { %v329_v24 = vmax.f32 %v325_v20, 0.0  ;;  %v330_v25 = vmax.f32 %v326_v21, 0.0  ;;  %v331_v26 = vmax.f32 %v327_v22, 0.0  ;;  %v332_v28 = vmax.f32 %v328_v23, 0.0 }
  0xdb   :  { %v343_v30 = vmul.f32 %v335_v18, %v329_v24  ;;  %v344_v61 = vmul.f32 %v336_v19, %v330_v25  ;;  %v345_v31 = vmul.f32 %v337_v27, %v331_v26  ;;  %v346_v32 = vmul.f32 %v338_v29, %v332_v28 }
  0xdd   :  { %v347_v46 = vadd.f32 %v344_v61, %v343_v30 }
  0xdf   :  { %v348_v47 = vadd.f32 %v347_v46, %v345_v31 }
  0xe1   :  { %v349_v33 = vadd.f32 %v348_v47, %v346_v32 }
  0xe3   :  { %350 = vadd.xlane.f32.xlu0 %v349_v33 }
  0xeb   :  { %360 = vadd.xlane.f32.xlu0 %v359_v37 }
 0x156   :  { %v351_v38 = vpop.xlane.xlu0 %350 }
 0x15e   :  { %v361_v40 = vpop.xlane.xlu0 %360 }
 0x15f   :  { %v362_v41 = vadd.f32 %v361_v40, %v351_v38 }
 0x161   :  { %v365_v42 = vadd.f32 %v364_v39, %v362_v41 }
 0x163   :  { %366 = vst [vmem:[#allocation8] sm:$0xff] %v365_v42 }
 0x164   :  { %377 = dma.vmem_to_hbm [thread:$0]  %s373_s25, 128, %s375_s27, [#allocation5]  }
 0x165   :  { %486 = dma.done.wait [#allocation5], 128  }
 0x166   :  { %487 = vsyncadd [#allocation5], 4294967168 }
 0x167   :  { %382 = vsyncpa [#allocation4], 1 }
 0x168   :  { %383 = vsyncpa [#allocation7], 1 }
 0x169   :  { %384 = vsyncpa [#allocation5], 1 }

</bundles_post_ra>
